<compile_context>
chip_gen: v6e
topology: v6e:2x2x1
jax: 0.10.0
libtpu: 0.0.40
codegen_flags: <defaults>
</compile_context>

<pallas_src>
import functools
import math

import jax
import jax.numpy as jnp
from jax.experimental import pallas as pl
from jax.experimental.pallas import tpu as pltpu


def _heads_per_block(num_heads, head_dim):
    """Smallest head group whose fused lane width (Hb*D) hits the MXU N width."""
    for lane_target in (256, 128):
        for hb in range(1, num_heads + 1):
            if num_heads % hb == 0 and (hb * head_dim) % lane_target == 0:
                return hb
    return num_heads  # small models: take all heads in one block


def _vmem_limit_bytes():
    # Raise the scoped-VMEM limit above the small default (16/32 MiB) but keep
    # headroom under physical capacity (notably v7x's 64 MiB).
    try:
        cap = pltpu.get_tpu_info().vmem_capacity_bytes
    except Exception:
        cap = 128 * 1024 * 1024
    return int(min(100 * 1024 * 1024, cap * 7 // 8))


# ----------------------------------------------------------------------------
# Fused kernel: QKV proj + masked softmax + @V  (per head block)  +  out_proj(x)
# ----------------------------------------------------------------------------
def _masked_mha_kernel(x_ref, wqkv_ref, bqkv_ref, mask_ref, wout_ref, bout_ref,
                       attn_ref, proj_ref, *, heads_per_block, head_dim, inv_scale):
    hb_idx = pl.program_id(1)                     # head-block index (inner axis)
    Hb, D = heads_per_block, head_dim
    HbD = Hb * D

    x = x_ref[0]                                  # (T, E) bf16, resident across head blocks
    T = x.shape[0]

    # ---- out_proj(x): the value the module returns.  Fused here (once per
    # batch) since x is already resident in VMEM; its output block index is
    # constant along the head-block axis, so the buffer stays resident and is
    # written back to HBM once per batch.
    @pl.when(hb_idx == 0)
    def _():
        y = jnp.dot(x, wout_ref[...], preferred_element_type=jnp.float32)
        proj_ref[0] = (y + bout_ref[...]).astype(proj_ref.dtype)

    # ---- single fused QKV projection for this head block:
    # (T, E) @ (E, 3*Hb*D), bf16 operands, f32 accumulation.
    w = wqkv_ref[hb_idx]                          # (E, 3*Hb*D) bf16, whole weight resident
    b = bqkv_ref[hb_idx]                          # (1, 3*Hb*D) f32
    qkv = jnp.dot(x, w, preferred_element_type=jnp.float32) + b      # (T, 3*Hb*D)

    q = jnp.transpose(qkv[:, 0 * HbD:1 * HbD].reshape(T, Hb, D), (1, 0, 2))
    k = jnp.transpose(qkv[:, 1 * HbD:2 * HbD].reshape(T, Hb, D), (1, 0, 2))
    v = jnp.transpose(qkv[:, 2 * HbD:3 * HbD].reshape(T, Hb, D), (1, 0, 2))

    # scores: per-head q @ k^T, bf16 MXU operands, f32 accumulation -> (Hb, T, T)
    s = jnp.einsum("hqd,hkd->hqk",
                   q.astype(jnp.bfloat16), k.astype(jnp.bfloat16),
                   preferred_element_type=jnp.float32)

    # masked_fill(attn_mask, -inf) as an additive bias built from the compact
    # int8 mask block (broadcasts over heads, and over queries for 2-D masks).
    bias = jnp.where(mask_ref[0].astype(jnp.float32) > 0.5,
                     jnp.float32(-jnp.inf), jnp.float32(0.0))        # (Tm, T)
    s = s + bias

    # softmax(dim=-1); numerically stabilized.  The 1/sum normalization and the
    # module's post-softmax 1/sqrt(D) are folded into ONE per-row scale applied
    # to the (T, D) result instead of two (T, T) elementwise passes.
    m = jnp.max(s, axis=-1, keepdims=True)
    e = jnp.exp(s - m)
    denom = jnp.sum(e, axis=-1, keepdims=True)                       # (Hb, T, 1)

    o = jnp.einsum("hqk,hkd->hqd",
                   e.astype(jnp.bfloat16), v.astype(jnp.bfloat16),
                   preferred_element_type=jnp.float32)               # (Hb, T, D)
    o = o * (jnp.float32(inv_scale) * pl.reciprocal(denom, approx=False))

    # write this head block's contiguous (lane-dense) column slice of (B, T, E);
    # no post-kernel transpose/reshape needed.
    attn_ref[0] = jnp.transpose(o, (1, 0, 2)).reshape(T, HbD).astype(attn_ref.dtype)


# ----------------------------------------------------------------------------
# Module-level forward (faithful to Masked_MHA.forward)
# ----------------------------------------------------------------------------
def masked_mha_forward(x, attn_mask, params, num_heads, *, return_attn=False):
    """Pallas port of Masked_MHA.forward.

    Like the PyTorch module, the masked attention is computed but the returned
    value is out_proj applied to the input x (`self.out_proj(x)`), not to
    attn_output.  Set return_attn=True to also get the attention result.
    """
    B, T, E = x.shape
    assert E % num_heads == 0, "embed_dim must be divisible by num_heads"
    H = num_heads
    D = E // H
    Hb = _heads_per_block(H, D)
    n_hblk = H // Hb
    HbD = Hb * D

    # bf16 MXU operands; accumulation stays f32 inside the kernel.
    x_bf16 = x.astype(jnp.bfloat16)

    # QKV weight: "applied" (E, 3E) matrix (qkv = x @ qkv_w + qkv_b) with the
    # 3E columns ordered (3, H, D) exactly as .view(B, T, 3, H, D) assumes.
    # Regrouped per head block -> (n_hblk, E, 3*Hb*D); a constant index_map
    # keeps the whole tensor resident in VMEM (DMA'd from HBM once).
    # TODO(synk): for very large E (3*E*E*2 bytes near the VMEM budget) tile
    # this per head block / K-tile instead of keeping it fully resident.
    wqkv = (params["qkv_w"].reshape(E, 3, n_hblk, Hb, D)
            .transpose(2, 0, 1, 3, 4).reshape(n_hblk, E, 3 * HbD)
            .astype(jnp.bfloat16))
    bqkv = (params["qkv_b"].reshape(3, n_hblk, Hb, D)
            .transpose(1, 0, 2, 3).reshape(n_hblk, 1, 3 * HbD)
            .astype(jnp.float32))
    wout = params["out_w"].astype(jnp.bfloat16)
    bout = params["out_b"].reshape(1, E).astype(jnp.float32)

    # Compact int8 mask: (B, 1, T) for 2-D key masks (broadcast over queries
    # inside the kernel), (B, T, T) for 3-D masks.  Nonzero == "masked out".
    m = jnp.asarray(attn_mask)
    if m.ndim == 2:
        m = m[:, None, :]
    elif m.ndim != 3:
        raise ValueError("attn_mask must be 2D or 3D (as in the PyTorch module)")
    Tm = m.shape[1]
    mask_i8 = jnp.broadcast_to(m != 0, (B, Tm, T)).astype(jnp.int8)

    flops = B * (2 * T * E * 3 * E + 2 * T * E * E) + B * H * 4 * T * T * D
    bytes_accessed = (2 * B * T * E + 2 * 3 * E * E + 4 * 3 * E + B * Tm * T
                      + 2 * E * E + 4 * E + 2 * 4 * B * T * E)
    cost = pl.CostEstimate(flops=flops, transcendentals=B * H * T * T,
                           bytes_accessed=bytes_accessed)

    kernel = functools.partial(_masked_mha_kernel, heads_per_block=Hb,
                               head_dim=D, inv_scale=1.0 / math.sqrt(D))

    # TODO(synk): for long sequences (T >~ 1K, esp. v7x's 64 MiB VMEM) tile the
    # key/value axis flash-attention style instead of a full (Hb, T, T) score block.
    attn_out, proj_out = pl.pallas_call(
        kernel,
        out_shape=(jax.ShapeDtypeStruct((B, T, E), x.dtype),   # attn_output
                   jax.ShapeDtypeStruct((B, T, E), x.dtype)),  # out_proj(x)
        grid=(B, n_hblk),
        in_specs=[
            # x / mask block indices are constant along the inner head-block
            # axis -> resident in VMEM, no re-DMA per head block.
            pl.BlockSpec((1, T, E), lambda b, h: (b, 0, 0)),
            pl.BlockSpec((n_hblk, E, 3 * HbD), lambda b, h: (0, 0, 0)),
            pl.BlockSpec((n_hblk, 1, 3 * HbD), lambda b, h: (0, 0, 0)),
            pl.BlockSpec((1, Tm, T), lambda b, h: (b, 0, 0)),
            pl.BlockSpec((E, E), lambda b, h: (0, 0)),
            pl.BlockSpec((1, E), lambda b, h: (0, 0)),
        ],
        out_specs=(
            # attention written straight into (B, T, E): lane-dense Hb*D-wide
            # column block per head block.
            pl.BlockSpec((1, T, HbD), lambda b, h: (b, 0, h)),
            # out_proj(x): constant index along the head-block axis -> written
            # once under pl.when(h == 0), so that axis must be "arbitrary".
            pl.BlockSpec((1, T, E), lambda b, h: (b, 0, 0)),
        ),
        compiler_params=pltpu.CompilerParams(
            # Batch axis "parallel" (megacore on v7x); head-block axis must be
            # "arbitrary" because the fused out_proj block is resident across it.
            dimension_semantics=("parallel", "arbitrary"),
            vmem_limit_bytes=_vmem_limit_bytes()),
        cost_estimate=cost,
    )(x_bf16, wqkv, bqkv, mask_i8, wout, bout)

    if return_attn:
        return proj_out, attn_out
    return proj_out   # identical to the PyTorch module's `return self.out_proj(x)`


# ----------------------------------------------------------------------------
# Pure-JAX reference (mirrors the PyTorch code line by line, full f32)
# ----------------------------------------------------------------------------
def _ref_forward(x, attn_mask, params, num_heads):
    B, T, E = x.shape
    D = E // num_heads
    qkv = x @ params["qkv_w"] + params["qkv_b"]
    qkv = qkv.reshape(B, T, 3, num_heads, D).transpose(2, 0, 3, 1, 4)
    q, k, v = qkv[0], qkv[1], qkv[2]
    s = jnp.einsum("bhtd,bhsd->bhts", q, k)
    m = jnp.asarray(attn_mask) != 0
    if m.ndim == 2:
        m = m[:, None, None, :]
    elif m.ndim == 3:
        m = m[:, None, :, :]
    m = jnp.broadcast_to(m, (B, num_heads, T, T))
    s = jnp.where(m, -jnp.inf, s)
    p = jax.nn.softmax(s, axis=-1)
    p = p / math.sqrt(D)                                  # scale AFTER softmax
    attn = jnp.einsum("bhts,bhsd->bhtd", p, v)
    attn = attn.transpose(0, 2, 1, 3).reshape(B, T, E)
    out = x @ params["out_w"] + params["out_b"]           # out_proj(x), as in the module
    return out, attn


if __name__ == "__main__":
    batch, seq_len, embed_dim, num_heads = 2, 8, 32, 4

    key = jax.random.PRNGKey(0)
    kx, kw1, kb1, kw2, kb2 = jax.random.split(key, 5)
    x = jax.random.normal(kx, (batch, seq_len, embed_dim), dtype=jnp.float32)
    params = {
        "qkv_w": jax.random.normal(kw1, (embed_dim, 3 * embed_dim), jnp.float32) * 0.1,
        "qkv_b": jax.random.normal(kb1, (3 * embed_dim,), jnp.float32) * 0.1,
        "out_w": jax.random.normal(kw2, (embed_dim, embed_dim), jnp.float32) * 0.1,
        "out_b": jax.random.normal(kb2, (embed_dim,), jnp.float32) * 0.1,
    }
    # 3D mask (B, T, T); nonzero/True = masked out (causal: mask the future)
    causal = jnp.triu(jnp.ones((seq_len, seq_len), jnp.float32), k=1)
    attn_mask = jnp.broadcast_to(causal, (batch, seq_len, seq_len))

    output, attn_output = masked_mha_forward(x, attn_mask, params, num_heads,
                                             return_attn=True)
    jax.block_until_ready((output, attn_output))

    ref_out, ref_attn = _ref_forward(x, attn_mask, params, num_heads)
    assert output.shape == (batch, seq_len, embed_dim)
    # Tolerances reflect bf16 MXU operands (f32 accumulation) vs. the f32 reference.
    assert jnp.allclose(output, ref_out, atol=2e-2, rtol=2e-2), "out_proj(x) mismatch"
    assert jnp.allclose(attn_output, ref_attn, atol=2e-2, rtol=2e-2), "attention mismatch"

    print("KERNEL_OK")
</pallas_src>

<mosaic_0001>
module attributes {stable_mosaic.version = 11 : i64} {
  func.func @_masked_mha_kernel(%arg0: i32, %arg1: i32, %arg2: memref<1x8x32xbf16, #tpu.memory_space<vmem>>, %arg3: memref<1x32x96xbf16, #tpu.memory_space<vmem>>, %arg4: memref<1x1x96xf32, #tpu.memory_space<vmem>>, %arg5: memref<1x8x8xi8, #tpu.memory_space<vmem>>, %arg6: memref<32x32xbf16, #tpu.memory_space<vmem>>, %arg7: memref<1x32xf32, #tpu.memory_space<vmem>>, %arg8: memref<1x8x32xf32, #tpu.memory_space<vmem>>, %arg9: memref<1x8x32xf32, #tpu.memory_space<vmem>>) attributes {dimension_semantics = [#tpu.dimension_semantics<parallel>, #tpu.dimension_semantics<arbitrary>], iteration_bounds = array<i64: 2, 1>, scalar_prefetch = 0 : i64, scratch_operands = 0 : i64, tpu.core_type = #tpu.core_type<tc>, window_params = [{transform_indices = @transform_0, window_bounds = array<i64: 1, 8, 32>}, {pipeline_mode = #tpu.pipeline_mode<synchronous>, transform_indices = @transform_1, window_bounds = array<i64: 1, 32, 96>}, {pipeline_mode = #tpu.pipeline_mode<synchronous>, transform_indices = @transform_2, window_bounds = array<i64: 1, 1, 96>}, {transform_indices = @transform_3, window_bounds = array<i64: 1, 8, 8>}, {pipeline_mode = #tpu.pipeline_mode<synchronous>, transform_indices = @transform_4, window_bounds = array<i64: 32, 32>}, {pipeline_mode = #tpu.pipeline_mode<synchronous>, transform_indices = @transform_5, window_bounds = array<i64: 1, 32>}, {transform_indices = @transform_6, window_bounds = array<i64: 1, 8, 32>}, {transform_indices = @transform_7, window_bounds = array<i64: 1, 8, 32>}]} {
    %c0 = arith.constant 0 : index
    %c0_0 = arith.constant 0 : index
    %c0_1 = arith.constant 0 : index
    %0 = vector.load %arg2[%c0, %c0_0, %c0_1] : memref<1x8x32xbf16, #tpu.memory_space<vmem>>, vector<1x8x32xbf16>
    %1 = vector.shape_cast %0 : vector<1x8x32xbf16> to vector<8x32xbf16>
    %c0_i32 = arith.constant 0 : i32
    %2 = arith.cmpi eq, %arg1, %c0_i32 : i32
    %3 = arith.extui %2 : i1 to i32
    %c0_i32_2 = arith.constant 0 : i32
    %4 = arith.cmpi ne, %3, %c0_i32_2 : i32
    scf.if %4 {
      %c0_21 = arith.constant 0 : index
      %c0_22 = arith.constant 0 : index
      %57 = vector.load %arg6[%c0_21, %c0_22] : memref<32x32xbf16, #tpu.memory_space<vmem>>, vector<32x32xbf16>
      %cst_23 = arith.constant dense<0.000000e+00> : vector<8x32xf32>
      %58 = tpu.matmul %1, %57, %cst_23 {dimension_numbers = #tpu.dot_dimension_numbers<[1], [0], [0], [1], [0, 0, 1, 1], [], []>} : vector<8x32xbf16>, vector<32x32xbf16>, vector<8x32xf32> -> vector<8x32xf32>
      %c0_24 = arith.constant 0 : index
      %c0_25 = arith.constant 0 : index
      %59 = vector.load %arg7[%c0_24, %c0_25] : memref<1x32xf32, #tpu.memory_space<vmem>>, vector<1x32xf32>
      %60 = vector.broadcast %59 : vector<1x32xf32> to vector<8x32xf32>
      %61 = arith.addf %58, %60 : vector<8x32xf32>
      %c0_26 = arith.constant 0 : index
      %c0_27 = arith.constant 0 : index
      %c0_28 = arith.constant 0 : index
      %62 = vector.load %arg9[%c0_26, %c0_27, %c0_28] : memref<1x8x32xf32, #tpu.memory_space<vmem>>, vector<1x8x32xf32>
      %63 = vector.shape_cast %62 : vector<1x8x32xf32> to vector<8x32xf32>
      %64 = vector.shape_cast %61 : vector<8x32xf32> to vector<1x8x32xf32>
      tpu.vector_store %arg9[%c0_26, %c0_27, %c0_28], %64 {strides = array<i32>} : memref<1x8x32xf32, #tpu.memory_space<vmem>>, vector<1x8x32xf32>,
    } else {
    }
    %5 = arith.index_cast %arg1 : i32 to index
    %c0_3 = arith.constant 0 : index
    %c0_4 = arith.constant 0 : index
    %6 = vector.load %arg3[%5, %c0_3, %c0_4] : memref<1x32x96xbf16, #tpu.memory_space<vmem>>, vector<1x32x96xbf16>
    %7 = vector.shape_cast %6 : vector<1x32x96xbf16> to vector<32x96xbf16>
    %8 = arith.index_cast %arg1 : i32 to index
    %c0_5 = arith.constant 0 : index
    %c0_6 = arith.constant 0 : index
    %9 = vector.load %arg4[%8, %c0_5, %c0_6] : memref<1x1x96xf32, #tpu.memory_space<vmem>>, vector<1x1x96xf32>
    %10 = vector.shape_cast %9 : vector<1x1x96xf32> to vector<1x96xf32>
    %cst = arith.constant dense<0.000000e+00> : vector<8x96xf32>
    %11 = tpu.matmul %1, %7, %cst {dimension_numbers = #tpu.dot_dimension_numbers<[1], [0], [0], [1], [0, 0, 1, 1], [], []>} : vector<8x32xbf16>, vector<32x96xbf16>, vector<8x96xf32> -> vector<8x96xf32>
    %12 = vector.broadcast %10 : vector<1x96xf32> to vector<8x96xf32>
    %13 = arith.addf %11, %12 : vector<8x96xf32>
    %14 = vector.extract_strided_slice %13 {offsets = [0, 0], sizes = [8, 32], strides = [1, 1]} : vector<8x96xf32> to vector<8x32xf32>
    %15 = vector.shape_cast %14 : vector<8x32xf32> to vector<8x4x8xf32>
    %16 = tpu.transpose %15, [1, 0, 2] : vector<8x4x8xf32> -> vector<4x8x8xf32>
    %17 = vector.extract_strided_slice %13 {offsets = [0, 32], sizes = [8, 32], strides = [1, 1]} : vector<8x96xf32> to vector<8x32xf32>
    %18 = vector.shape_cast %17 : vector<8x32xf32> to vector<8x4x8xf32>
    %19 = tpu.transpose %18, [1, 0, 2] : vector<8x4x8xf32> -> vector<4x8x8xf32>
    %20 = vector.extract_strided_slice %13 {offsets = [0, 64], sizes = [8, 32], strides = [1, 1]} : vector<8x96xf32> to vector<8x32xf32>
    %21 = vector.shape_cast %20 : vector<8x32xf32> to vector<8x4x8xf32>
    %22 = tpu.transpose %21, [1, 0, 2] : vector<8x4x8xf32> -> vector<4x8x8xf32>
    %23 = arith.truncf %16 : vector<4x8x8xf32> to vector<4x8x8xbf16>
    %24 = arith.truncf %19 : vector<4x8x8xf32> to vector<4x8x8xbf16>
    "tpu.trace_start"() <{level = 10 : i32, message = "hqd,hkd->hqk"}> : () -> ()
    %cst_7 = arith.constant dense<0.000000e+00> : vector<4x8x8xf32>
    %25 = tpu.matmul %23, %24, %cst_7 {dimension_numbers = #tpu.dot_dimension_numbers<[2], [2], [1], [1], [0, 0, 0, 1, 1, 1], [0], [0]>} : vector<4x8x8xbf16>, vector<4x8x8xbf16>, vector<4x8x8xf32> -> vector<4x8x8xf32>
    "tpu.trace_stop"() : () -> ()
    %c0_8 = arith.constant 0 : index
    %c0_9 = arith.constant 0 : index
    %c0_10 = arith.constant 0 : index
    %26 = vector.load %arg5[%c0_8, %c0_9, %c0_10] : memref<1x8x8xi8, #tpu.memory_space<vmem>>, vector<1x8x8xi8>
    %27 = vector.shape_cast %26 : vector<1x8x8xi8> to vector<8x8xi8>
    %28 = arith.sitofp %27 : vector<8x8xi8> to vector<8x8xf32>
    %cst_11 = arith.constant 5.000000e-01 : f32
    %29 = vector.broadcast %cst_11 : f32 to vector<8x8xf32>
    %30 = arith.cmpf ogt, %28, %29 : vector<8x8xf32>
    %cst_12 = arith.constant 0xFF800000 : f32
    %cst_13 = arith.constant 0.000000e+00 : f32
    %31 = vector.broadcast %cst_12 : f32 to vector<8x8xf32>
    %32 = vector.broadcast %cst_13 : f32 to vector<8x8xf32>
    %33 = arith.select %30, %31, %32 : vector<8x8xi1>, vector<8x8xf32>
    %34 = vector.shape_cast %33 : vector<8x8xf32> to vector<1x8x8xf32>
    %35 = vector.broadcast %34 : vector<1x8x8xf32> to vector<4x8x8xf32>
    %36 = arith.addf %25, %35 : vector<4x8x8xf32>
    %cst_14 = arith.constant dense<0xFF800000> : vector<4x8xf32>
    %37 = vector.multi_reduction <maximumf>, %36, %cst_14 [2] : vector<4x8x8xf32> to vector<4x8xf32>
    %38 = vector.shape_cast %37 : vector<4x8xf32> to vector<4x8x1xf32>
    %39 = vector.broadcast %38 : vector<4x8x1xf32> to vector<4x8x8xf32>
    %40 = arith.subf %36, %39 : vector<4x8x8xf32>
    %41 = math.exp %40 : vector<4x8x8xf32>
    %cst_15 = arith.constant dense<0.000000e+00> : vector<4x8xf32>
    %42 = vector.multi_reduction <add>, %41, %cst_15 [2] : vector<4x8x8xf32> to vector<4x8xf32>
    %43 = vector.shape_cast %42 : vector<4x8xf32> to vector<4x8x1xf32>
    %44 = arith.truncf %41 : vector<4x8x8xf32> to vector<4x8x8xbf16>
    %45 = arith.truncf %22 : vector<4x8x8xf32> to vector<4x8x8xbf16>
    "tpu.trace_start"() <{level = 10 : i32, message = "hqk,hkd->hqd"}> : () -> ()
    %cst_16 = arith.constant dense<0.000000e+00> : vector<4x8x8xf32>
    %46 = tpu.matmul %44, %45, %cst_16 {dimension_numbers = #tpu.dot_dimension_numbers<[2], [1], [1], [2], [0, 0, 0, 1, 1, 2], [0], [0]>} : vector<4x8x8xbf16>, vector<4x8x8xbf16>, vector<4x8x8xf32> -> vector<4x8x8xf32>
    "tpu.trace_stop"() : () -> ()
    %47 = tpu.reciprocal %43 : vector<4x8x1xf32> -> vector<4x8x1xf32>
    %cst_17 = arith.constant 0.353553385 : f32
    %48 = vector.broadcast %cst_17 : f32 to vector<4x8x1xf32>
    %49 = arith.mulf %48, %47 : vector<4x8x1xf32>
    %50 = vector.broadcast %49 : vector<4x8x1xf32> to vector<4x8x8xf32>
    %51 = arith.mulf %46, %50 : vector<4x8x8xf32>
    %52 = tpu.transpose %51, [1, 0, 2] : vector<4x8x8xf32> -> vector<8x4x8xf32>
    %53 = vector.shape_cast %52 : vector<8x4x8xf32> to vector<8x32xf32>
    %c0_18 = arith.constant 0 : index
    %c0_19 = arith.constant 0 : index
    %c0_20 = arith.constant 0 : index
    %54 = vector.load %arg8[%c0_18, %c0_19, %c0_20] : memref<1x8x32xf32, #tpu.memory_space<vmem>>, vector<1x8x32xf32>
    %55 = vector.shape_cast %54 : vector<1x8x32xf32> to vector<8x32xf32>
    %56 = vector.shape_cast %53 : vector<8x32xf32> to vector<1x8x32xf32>
    tpu.vector_store %arg8[%c0_18, %c0_19, %c0_20], %56 {strides = array<i32>} : memref<1x8x32xf32, #tpu.memory_space<vmem>>, vector<1x8x32xf32>,
    return
  }
  func.func @transform_0(%arg0: i32, %arg1: i32) -> (i32, i32, i32) {
    %c0_i32 = arith.constant 0 : i32
    %c0_i32_0 = arith.constant 0 : i32
    %c0_i32_1 = arith.constant 0 : i32
    return %arg0, %c0_i32, %c0_i32_0 : i32, i32, i32
  }
  func.func @transform_1(%arg0: i32, %arg1: i32) -> (i32, i32, i32) {
    %c0_i32 = arith.constant 0 : i32
    %c0_i32_0 = arith.constant 0 : i32
    %c0_i32_1 = arith.constant 0 : i32
    %c0_i32_2 = arith.constant 0 : i32
    return %c0_i32, %c0_i32_0, %c0_i32_1 : i32, i32, i32
  }
  func.func @transform_2(%arg0: i32, %arg1: i32) -> (i32, i32, i32) {
    %c0_i32 = arith.constant 0 : i32
    %c0_i32_0 = arith.constant 0 : i32
    %c0_i32_1 = arith.constant 0 : i32
    %c0_i32_2 = arith.constant 0 : i32
    return %c0_i32, %c0_i32_0, %c0_i32_1 : i32, i32, i32
  }
  func.func @transform_3(%arg0: i32, %arg1: i32) -> (i32, i32, i32) {
    %c0_i32 = arith.constant 0 : i32
    %c0_i32_0 = arith.constant 0 : i32
    %c0_i32_1 = arith.constant 0 : i32
    return %arg0, %c0_i32, %c0_i32_0 : i32, i32, i32
  }
  func.func @transform_4(%arg0: i32, %arg1: i32) -> (i32, i32) {
    %c0_i32 = arith.constant 0 : i32
    %c0_i32_0 = arith.constant 0 : i32
    %c0_i32_1 = arith.constant 0 : i32
    return %c0_i32, %c0_i32_0 : i32, i32
  }
  func.func @transform_5(%arg0: i32, %arg1: i32) -> (i32, i32) {
    %c0_i32 = arith.constant 0 : i32
    %c0_i32_0 = arith.constant 0 : i32
    %c0_i32_1 = arith.constant 0 : i32
    return %c0_i32, %c0_i32_0 : i32, i32
  }
  func.func @transform_6(%arg0: i32, %arg1: i32) -> (i32, i32, i32) {
    %c0_i32 = arith.constant 0 : i32
    %c0_i32_0 = arith.constant 0 : i32
    return %arg0, %c0_i32, %arg1 : i32, i32, i32
  }
  func.func @transform_7(%arg0: i32, %arg1: i32) -> (i32, i32, i32) {
    %c0_i32 = arith.constant 0 : i32
    %c0_i32_0 = arith.constant 0 : i32
    %c0_i32_1 = arith.constant 0 : i32
    return %arg0, %c0_i32, %c0_i32_0 : i32, i32, i32
  }
}

</mosaic_0001>

<bundles_post_ra>
// kernel: tpu_custom_call.1
= control target key start
LH: loop header
LB: loop body
LE: loop exit
PB: predicated region body
PF: predicated region fallthrough
CT: control target
= control target key end

     0   :  { %s2617_s0 = inlined_call_operand.hbm [shape: bf16[2,8,32], index: 0, kind: input, shape index: {}]   ;;  %s2618_s1 = inlined_call_operand.hbm [shape: bf16[1,32,96], index: 1, kind: input, shape index: {}]   ;;  %s2619_s2 = inlined_call_operand.vmem [shape: f32[1,1,96], index: 2, kind: input, shape index: {}]   ;;  %s2620_s3 = inlined_call_operand.vmem [shape: s8[2,8,8], index: 3, kind: input, shape index: {}]   ;;  %s2621_s4 = inlined_call_operand.hbm [shape: bf16[32,32], index: 4, kind: input, shape index: {}]   ;;  %s2622_s5 = inlined_call_operand.vmem [shape: f32[1,32], index: 5, kind: input, shape index: {}]   ;;  %s2623_s6 = inlined_call_operand.hbm [shape: f32[2,8,32], index: 6, kind: output, shape index: {0}]   ;;  %s2624_s7 = inlined_call_operand.hbm [shape: f32[2,8,32], index: 7, kind: output, shape index: {1}]  }
   0x1   :  { %2629 = sst [smem:[#allocation16_spill]] %s2618_s1 }
   0x2   :  { %2630 = sst [smem:[#allocation17_spill]] %s2621_s4 }
   0x3   :  { %13 = vsyncpa [#allocation3], 0 }
   0x4   :  { %15 = vsyncpa [#allocation3 + $0x1], 0 }
   0x5   :  { %16 = vsyncpa [#allocation6], 0 }
   0x6   :  { %17 = vsyncpa [#allocation4], 0 }
   0x7   :  { %19 = vsyncpa [#allocation4 + $0x1], 0 }
   0x8   :  { %20 = vsyncpa [#allocation10], 0 }
   0x9   :  { %22 = vsyncpa [#allocation10 + $0x1], 0  ;;  %s2231_s24 = smov 0   ;;  %s2233_s25 = smov 0  }
   0xa   :  { %s2235_s26 = smov 0   ;;  %s2237_s27 = smov 0  }
   0xb   :  { %s2239_s28 = smov 0   ;;  %s2241_s29 = smov 0  }
   0xc LB: > { %s1723_s30 = sadd.s32 4294967295, %s2170_s29   ;;  %s1724_s8 = sadd.s32 4294967294, %s2170_s29   ;;  %s2170_s29 = sphi %s2241_s29, %s28_s29   ;;  %s2166_s28 = sphi %s2239_s28, %s2651_s28   ;;  %s2162_s27 = sphi %s2237_s27, %s2650_s27   ;;  %s2158_s26 = sphi %s2235_s26, %s2649_s26   ;;  %s2154_s25 = sphi %s2233_s25, %s2648_s25   ;;  %s2150_s24 = sphi %s2231_s24, %s2647_s24  }
   0xd   : > { %p60_p0 = scmp.ne.s32.totalorder %s2154_s25, %s2150_s24  ;;  %p2265_p1 = scmp.eq.s32.totalorder %s1723_s30, 0 }
   0xe   : > { %p2269_p2 = scmp.eq.s32.totalorder %s1723_s30, 1  ;;  %p202_p3 = scmp.eq.s32.totalorder %s1724_s8, 1 }
   0xf   : > { %s2631_s9 = scalar_select %p2265_p1, 1, 0 }
  0x10   : > { %p2275_p4 = por %p2265_p1, %p60_p0  ;;  %p1725_p5 = scmp.ge.s32.totalorder %s2170_s29, 1 }
  0x11   : > { %p2280_p6 = por %p202_p3, %p60_p0  ;;  %p235_p7 = scmp.lt.s32.totalorder %s2170_s29, 3 }
  0x12   : > { %s2633_s11 = scalar_select %p2275_p4, 1, 0 }
  0x13   : > { %s2634_s12 = scalar_select %p2280_p6, 1, 0 }
  0x14   : > { %p2285_p8 = pnand %p1725_p5, %p235_p7  ;;  %s2172_s14 = smov [#allocation5]  }
  0x15   : > { %s247_s15 = sshll.u32 %s2172_s14, 4  ;;  %s2173_s17 = smov [#allocation7]   ;;  %s248_s15 = int_to_ptr.vmem [resolvable:$true] %s247_s15 }
  0x16   : > { %p1868_p9 = pneg %p2285_p8  ;;  %s263_s18 = sshll.u32 %s2173_s17, 4  ;;  %s264_s18 = int_to_ptr.vmem [resolvable:$true] %s263_s18 }
  0x17   : > { %s1987_s19 = scalar_lea.vmem %s248_s15, 256  ;;  %p1995_p5 = scmp.lt.s32.totalorder %s248_s15, %s248_s15 }
  0x18   : > { %p2294_p11 = pnand %p1868_p9, %p2265_p1  ;;  %p1988_p13 = scmp.ne.s32.totalorder %s248_s15, %s1987_s19 }
  0x19   : > { %p1996_p7 = scmp.lt.s32.totalorder %s1987_s19, %s1987_s19 }
  0x1a   : > { %p1978_p12 = pneg %p2294_p11 }
  0x1b   : > { %p1997_p10 = por %p1996_p7, %p1995_p5 }
  0x1c   : > { %p1990_p0 = pnand %p1988_p13, %p1978_p12 }
  0x1e   : > { %p1991_p3 = pneg %p1990_p0 }
  0x20   : > { %p1998_p9 = pnand %p1997_p10, %p1991_p3 }
  0x22   : > { %2001 = shalt.err (!%p1998_p9)
}
  0x23   : > { %s2174_s20 = smov 64   ;;  %s2175_s21 = smov 4  }
  0x24   : > { %s2637_s1 = sld [smem:[#allocation16_spill]]  ;;  %s2013_s30 = scalar_lea.vmem %s264_s18, 256 }
  0x25   : > { %p2014_p6 = scmp.ne.s32.totalorder %s264_s18, %s2013_s30  ;;  %p2021_p1 = scmp.lt.s32.totalorder %s264_s18, %s264_s18 }
  0x26   : > { %p2022_p4 = scmp.lt.s32.totalorder %s2013_s30, %s2013_s30 }
  0x27   : > { %p2016_p13 = pnand %p2014_p6, %p1978_p12 }
  0x28   : > { %p2023_p5 = por %p2022_p4, %p2021_p1 }
  0x29   : > { %p2017_p0 = pneg %p2016_p13 }
  0x2a   : > { %1871 = dma.hbm_to_vmem [thread:$0]  (!%p2294_p11), %s2637_s1, 256, %s248_s15, [#allocation6], %s2174_s20, %s2174_s20, %s2175_s21  }
  0x2b   : > { %p2024_p10 = pnand %p2023_p5, %p2017_p0 }
  0x2d   : > { %2027 = shalt.err (!%p2024_p10)
}
  0x2e   : > { %s2638_s4 = sld [smem:[#allocation17_spill]]  ;;  %s40_s15 = sadd.s32 1, %s2166_s28 }
  0x2f   : > { %s47_s17 = sadd.s32 1, %s2158_s26  ;;  %p42_p1 = scmp.ge.s32.totalorder %s40_s15, 2 }
  0x30   : > { %p54_p4 = scmp.ne.s32.totalorder %s2158_s26, %s2154_s25  ;;  %p55_p6 = scmp.eq.s32.totalorder %s2170_s29, 0 }
  0x31   : > { %p1888_p12 = scmp.lt.s32.totalorder %s2170_s29, 2  ;;  %s2653_s15 = smov (%p42_p1, %s40_s15), 0 }
  0x32   : > { %2639 = sst [smem:[#allocation15_spill]] %s2653_s15  ;;  %p56_p3 = por %p55_p6, %p54_p4 }
  0x33   : > { %p2326_p7 = por %p2269_p2, %p54_p4  ;;  %s44_s19 = ssub.s32 %s2166_s28, %s2653_s15 }
  0x34   : > { %1874 = dma.hbm_to_vmem [thread:$0]  (!%p2294_p11), %s2638_s4, 256, %s264_s18, [#allocation6], %s2174_s20, %s2174_s20, %s2175_s21  }
  0x35   : > { %s280_s22 = sand.u32 1, %s2158_s26   ;;  %p45_p9 = scmp.eq.s32.totalorder %s44_s19, 0 }
  0x36   : > { %s1729_s18 = sshll.u32 %s280_s22, 2  ;;  %s1730_s20 = sshll.u32 %s2166_s28, 6 }
  0x37   : > { %s2335_s21 = scalar_select %p45_p9, %s2158_s26, %s47_s17  }
  0x38   : > { %s289_s8 = scalar_lea.hbm %s2617_s0, %s1730_s20  ;;  %s284_s14 = scalar_lea.vmem [#allocation2], %s1729_s18 }
  0x39   : > { %s291_s1 = sshll.u32 %s284_s14, 4  ;;  %p2342_p11 = pnand %p1888_p12, %p56_p3  ;;  %s292_s1 = int_to_ptr.vmem [resolvable:$true] %s291_s1 }
  0x3a   : > { %s281_s4 = scalar_lea.sflag [#allocation3], %s280_s22  ;;  %s2041_s19 = scalar_lea.vmem %s292_s1, 64 }
  0x3b   : > { %p2030_p2 = pneg %p2342_p11  ;;  %p2042_p13 = scmp.ne.s32.totalorder %s292_s1, %s2041_s19 }
  0x3c   : > { %s2176_s17 = smov [#allocation2]  }
  0x3d   : > { %p2044_p0 = pnand %p2042_p13, %p2030_p2  ;;  %s2046_s15 = sshll.u32 %s2176_s17, 4  ;;  %s2047_s15 = int_to_ptr.vmem [resolvable:$false] %s2046_s15 }
  0x3e   : > { %s2048_s20 = scalar_lea.vmem %s2047_s15, 128  ;;  %p2049_p10 = scmp.lt.s32.totalorder %s292_s1, %s2047_s15 }
  0x3f   : > { %p2045_p5 = pneg %p2044_p0  ;;  %p2050_p1 = scmp.lt.s32.totalorder %s2048_s20, %s2041_s19 }
  0x41   : > { %p2051_p4 = por %p2050_p1, %p2049_p10 }
  0x43   : > { %p2052_p6 = pnand %p2051_p4, %p2045_p5 }
  0x45   : > { %2055 = shalt.err (!%p2052_p6)
}
  0x46   : > { %1878 = dma.hbm_to_vmem [thread:$0]  (!%p2342_p11), %s289_s8, 64, %s292_s1, %s281_s4  }
  0x47   : > { %307 = sbr.rel (%p2285_p8) target bundleno = 1311 (0x51f), region = 44  ;;  %s2353_s22 = sand.u32 (!%p2285_p8), 1, %s2154_s25  }
  0x48   : > { %s1732_s18 = sshll.u32 (!%p2285_p8), %s2353_s22, 2  ;;  %s310_s23 = scalar_lea.sflag (!%p2285_p8), [#allocation3], %s2353_s22 }
  0x49   : > { %s313_s30 = scalar_lea.vmem (!%p2285_p8), [#allocation2], %s1732_s18  ;;  %p2642_p12 = scmp.ne.s32.totalorder (!%p2285_p8), %s2633_s11, 0 }
  0x4c   : > { %2133 = dma.done.wait (%p2642_p12), %s310_s23, 64  }
  0x4d   : > { %2135 = vsyncadd (%p2642_p12), %s310_s23, 4294967232  ;;  %p2643_p3 = scmp.ne.s32.totalorder %s2631_s9, 0 }
  0x4f   : > { %2137 = dma.done.wait (%p2643_p3), [#allocation6], 512  }
  0x50   : > { %2139 = vsyncadd (%p2643_p3), [#allocation6], 4294966784  ;;  %v2177_v0 = vmov 0.0   ;;  %vm2178_vm0 = vmmov 0   ;;  %v1956_v1 = vld [vmem:[#allocation5 + $0x8] sm:$0xff]   ;;  %v1957_v2 = vld [vmem:[#allocation5] sm:$0xff]   ;;  %v525_v17 = vlaneseq }
  0x51   : > { %1798 = vmatprep.subr.bf16.mxu1 %v2177_v0  ;;  %1802 = vmatprep.mubr.msk.bf16.mxu1 %vm2178_vm0, %v2177_v0  ;;  %v366_v3 = vld [vmem:[%s313_s30] sm:$0xf]  ;;  %vm394_vm1 = vcmask 261120   ;;  %s2179_s9 = smov 104   ;;  %s2180_s11 = smov 120   ;;  %v1959_v12 = vld [vmem:[#allocation7] sm:$0xff]  }
  0x52   : > { %1790 = vmatprep.subr.bf16.mxu0 %v2177_v0  ;;  %1794 = vmatprep.mubr.msk.bf16.mxu0 %vm2178_vm0, %v2177_v0  ;;  %v1742_v4 = vld [vmem:[%s2619_s2] ss:$0 sm:$0xff]  ;;  %s2181_s13 = smov 96   ;;  %s2182_s15 = smov 112   ;;  %v2184_v15 = vmov 1983009808  }
  0x53   : > { %1799 = vmatpush3.bf16.msra.mxu1 %v1956_v1  ;;  %v1958_v10 = vld [vmem:[#allocation7 + $0x8] sm:$0xff]   ;;  %s2183_s8 = smov 64   ;;  %v523_v16 = vunpack.c.l.s4 %v2184_v15  ;;  %v526_v19 = vshrl.u32 %v525_v17, 7  ;;  %v2185_v20 = vmov 1934713408   ;;  %vm965_vm2 = vcmask 64512  }
  0x54   : > { %1800 = vmatprep.subr.bf16.mxu1 %v2177_v0  ;;  %1791 = vmatpush3.bf16.msra.mxu0 %v1958_v10  ;;  %v555_v21 = vunpack.c.l.s4 %v2185_v20  ;;  %s1735_s19 = sshll.u32 %s2353_s22, 3  ;;  %p361_p8 = scmp.lt.s32.totalorder %s2162_s27, 1  ;;  %vm1197_vm4 = vcmask 1043456  }
  0x55   : > { %1792 = vmatprep.subr.bf16.mxu0 %v2177_v0  ;;  %v524_v18 = vunpack.c.0.s8 %v523_v16  ;;  %s2458_s17 = scalar_lea.vmem [#allocation9], %s1735_s19  ;;  %s1764_s4 = sshll.u32 %s2162_s27, 7 }
  0x56   : > { %v556_v27 = vunpack.c.0.s8 %v555_v21  ;;  %s362_s20 = scalar_select %p361_p8, %s2162_s27, 1 }
  0x57   : > { %1801 = vmatpush3.bf16.msra.mxu1 %v1957_v2  ;;  %v2394_v24 = vsub.s32 %v524_v18, %v526_v19  ;;  %s2186_s10 = smov [#allocation9]  }
  0x58   : > { %1812 = vmatprep.subr.bf16.mxu1 %v2177_v0  ;;  %1793 = vmatpush3.bf16.msra.mxu0 %v1959_v12  ;;  %v2402_v34 = vsub.s32 %v556_v27, %v526_v19  ;;  %s1737_s18 = sshll.u32 %s362_s20, 1 }
  0x59   : > { %1806 = vmatprep.subr.bf16.mxu0 %v2177_v0  ;;  %s364_s1 = scalar_lea.vmem %s2620_s3, %s1737_s18 }
  0x5a   : > { %1803 = vmatmul.mubr.msk.bf16.vlgmr.msra.gmra.mxu1 %vm394_vm1, %v366_v3 }
  0x5b   : > { %1814 = vmatprep.mubr.msk.bf16.mxu1 %vm2178_vm0, %v2177_v0  ;;  %1795 = vmatmul.mubr.msk.bf16.vlgmr.msra.gmra.mxu0 %vm394_vm1, %v366_v3 }
  0x5c   : > { %1808 = vmatprep.mubr.msk.bf16.mxu0 %vm2178_vm0, %v2177_v0 }
 0x11a   : > { %v504_v5 = vpop.f32.mrf.mxu1 }
 0x11b   : > { %v505_v6 = vadd.f32 %v1742_v4, %v504_v5 }
 0x11c   : > { %v1804_v7 = vpop.f32.mrf.mxu1 }
 0x11d   : > { %517 = vrot.lane.b32.xlu1 %v505_v6, %s2179_s9  ;;  %511 = vrot.lane.b32.xlu0 %v505_v6, %s2180_s11 }
 0x11e   : > { %v507_v8 = vpop.f32.mrf.mxu1 }
 0x120   : > { %v1805_v9 = vpop.f32.mrf.mxu1 }
 0x121   : > { %656 = vrot.lane.b32.xlu1 %v505_v6, %s2181_s13  ;;  %514 = vrot.lane.b32.xlu0 %v505_v6, %s2182_s15  ;;  %s1578_s15 = sshll.u32 %s2458_s17, 4  ;;  %s2539_s15 = int_to_ptr.vmem [resolvable:$true] %s1578_s15 }
 0x122   : > { %s2056_s14 = scalar_lea.vmem %s2539_s15, 128 }
 0x123   : > { %p2057_p9 = scmp.ne.s32.totalorder %s2539_s15, %s2056_s14 }
 0x125   : > { %p2058_p11 = pnand %p2057_p9, %p2326_p7 }
 0x127   : > { %p2059_p2 = pneg %p2058_p11 }
 0x18f   : > { %v512_v11 = vpop.permute.xlu0 %511  ;;  %v2380_v13 = vpop.permute.xlu1 %517 }
 0x190   : > { %658 = vrot.lane.b32.xlu0 %v512_v11, %s2181_s13  ;;  %v536_v25 = vcombine.low %v512_v11, %v2380_v13  ;;  %v537_v26 = vcombine.high %v512_v11, %v2380_v13 }
 0x192   : > { %v544_v30 = vrot.slane %v536_v25, %v2394_v24  ;;  %v551_v31 = vrot.slane %v537_v26, %v2394_v24 }
 0x193   : > { %v2382_v14 = vpop.permute.xlu0 %514  ;;  %v657_v32 = vpop.permute.xlu1 %656 }
 0x194   : > { %662 = vrot.lane.b32.xlu0 %v2380_v13, %s2181_s13  ;;  %660 = vrot.lane.b32.xlu1 %v2382_v14, %s2181_s13  ;;  %v520_v22 = vcombine.low %v505_v6, %v2382_v14  ;;  %v521_v23 = vcombine.high %v505_v6, %v2382_v14  ;;  %s2536_s13 = scalar_lea.hbm %s2624_s7, %s1764_s4 }
 0x196   : > { %v528_v28 = vrot.slane %v520_v22, %v2394_v24  ;;  %v535_v29 = vrot.slane %v521_v23, %v2394_v24 }
 0x198   : > { %804 = vrot.lane.b32.xlu0 %v505_v6, %s2183_s8  ;;  %806 = vrot.lane.b32.xlu1 %v512_v11, %s2183_s8  ;;  %v552_v35 = vcombine.low %v528_v28, %v544_v30  ;;  %v553_v36 = vcombine.high %v528_v28, %v544_v30  ;;  %v568_v37 = vcombine.low %v535_v29, %v551_v31 }
 0x199   : > { %v569_v38 = vcombine.high %v535_v29, %v551_v31 }
 0x19a   : > { %v560_v45 = vrot.slane %v552_v35, %v2402_v34  ;;  %v567_v46 = vrot.slane %v553_v36, %v2402_v34  ;;  %v576_v47 = vrot.slane %v568_v37, %v2402_v34 }
 0x19b   : > { %v583_v48 = vrot.slane %v569_v38, %v2402_v34 }
 0x19c   : > { %v588_v57 = vcombine.low %v560_v45, %v567_v46  ;;  %v1746_v58 = vcombine.high %v560_v45, %v567_v46 }
 0x19d   : > { %v604_v59 = vcombine.low %v576_v47, %v583_v48  ;;  %v1747_v60 = vcombine.high %v576_v47, %v583_v48 }
 0x19e   : > { %v595_v6 = vrot.slane %v588_v57, %v2394_v24  ;;  %v603_v7 = vrot.slane %v1746_v58, %v2394_v24 }
 0x19f   : > { %v611_v8 = vrot.slane %v604_v59, %v2394_v24  ;;  %v619_v9 = vrot.slane %v1747_v60, %v2394_v24  ;;  %v960_v60 = vld [vmem:[%s364_s1] sm:$0x3] }
 0x1a0   : > { %v620_v22 = vcombine.low %v595_v6, %v603_v7  ;;  %v621_v38 = vcombine.high %v595_v6, %v603_v7 }
 0x1a1   : > { %v636_v23 = vcombine.low %v611_v8, %v619_v9 }
 0x1a2   : > { %v628_v31 = vrot.slane %v620_v22, %v2402_v34  ;;  %v635_v46 = vrot.slane %v621_v38, %v2402_v34 }
 0x202   : > { %v659_v33 = vpop.permute.xlu0 %658 }
 0x206   : > { %v661_v39 = vpop.permute.xlu1 %660  ;;  %v663_v40 = vpop.permute.xlu0 %662 }
 0x207   : > { %v668_v41 = vcombine.low %v657_v32, %v661_v39  ;;  %v669_v42 = vcombine.high %v657_v32, %v661_v39  ;;  %v684_v43 = vcombine.low %v659_v33, %v663_v40  ;;  %v685_v44 = vcombine.high %v659_v33, %v663_v40 }
 0x208   : > { %v644_v32 = vrot.slane %v636_v23, %v2402_v34 }
 0x209   : > { %v676_v49 = vrot.slane %v668_v41, %v2394_v24  ;;  %v683_v50 = vrot.slane %v669_v42, %v2394_v24  ;;  %v692_v51 = vrot.slane %v684_v43, %v2394_v24  ;;  %v699_v52 = vrot.slane %v685_v44, %v2394_v24 }
 0x20a   : > { %v652_v39 = vcombine.low %v628_v31, %v644_v32  ;;  %v653_v40 = vcombine.high %v628_v31, %v644_v32  ;;  %v637_v41 = vcombine.high %v611_v8, %v619_v9 }
 0x20b   : > { %v700_v53 = vcombine.low %v676_v49, %v692_v51  ;;  %v701_v54 = vcombine.high %v676_v49, %v692_v51  ;;  %v716_v55 = vcombine.low %v683_v50, %v699_v52  ;;  %v717_v56 = vcombine.high %v683_v50, %v699_v52 }
 0x20c   : > { %v952_v44 = vpack.c.bf16 %v652_v39, %v652_v39  ;;  %v953_v45 = vpack.c.bf16 %v653_v40, %v653_v40  ;;  %v651_v47 = vrot.slane %v637_v41, %v2402_v34 }
 0x20d   : > { %v708_v61 = vrot.slane %v700_v53, %v2402_v34  ;;  %v715_v62 = vrot.slane %v701_v54, %v2402_v34  ;;  %v724_v63 = vrot.slane %v716_v55, %v2402_v34  ;;  %v731_v1 = vrot.slane %v717_v56, %v2402_v34  ;;  %v432_v54 = vpop.f32.mrf.mxu0  ;;  %v1738_v55 = vld [vmem:[%s2622_s5] ss:$0 sm:$0xff] }
 0x20e   : > { %v654_v50 = vcombine.low %v635_v46, %v651_v47  ;;  %v655_v51 = vcombine.high %v635_v46, %v651_v47  ;;  %v433_v58 = vadd.f32 %v1738_v55, %v432_v54 }
 0x20f   : > { %v736_v2 = vcombine.low %v708_v61, %v715_v62  ;;  %v1748_v3 = vcombine.high %v708_v61, %v715_v62  ;;  %v752_v4 = vcombine.low %v724_v63, %v731_v1  ;;  %v1749_v5 = vcombine.high %v724_v63, %v731_v1  ;;  %v1796_v56 = vpop.f32.mrf.mxu0 }
 0x210   : > { %v954_v52 = vpack.c.bf16 %v654_v50, %v654_v50  ;;  %v955_v53 = vpack.c.bf16 %v655_v51, %v655_v51  ;;  %438 = vst.msk [vmem:[%s2458_s17] sm:$0xff] %vm394_vm1, %v433_v58  ;;  %v961_v61 = vunpack.c.0.s8 %v960_v60  ;;  %s2060_s17 = sshll.u32 %s2186_s10, 4  ;;  %s2061_s17 = int_to_ptr.vmem [resolvable:$false] %s2060_s17 }
 0x211   : > { %v743_v10 = vrot.slane %v736_v2, %v2394_v24  ;;  %v751_v11 = vrot.slane %v1748_v3, %v2394_v24  ;;  %v759_v12 = vrot.slane %v752_v4, %v2394_v24  ;;  %v767_v15 = vrot.slane %v1749_v5, %v2394_v24  ;;  %v435_v57 = vpop.f32.mrf.mxu0  ;;  %s2062_s20 = scalar_lea.vmem %s2061_s17, 256  ;;  %p2063_p13 = scmp.lt.s32.totalorder %s2539_s15, %s2061_s17 }
 0x212   : > { %v962_v62 = vcvt.s32.f32 %v961_v61  ;;  %p2064_p0 = scmp.lt.s32.totalorder %s2062_s20, %s2056_s14 }
 0x213   : > { %v768_v16 = vcombine.low %v743_v10, %v751_v11  ;;  %v784_v17 = vcombine.low %v759_v12, %v767_v15  ;;  %v769_v18 = vcombine.high %v743_v10, %v751_v11  ;;  %v785_v19 = vcombine.high %v759_v12, %v767_v15  ;;  %v1797_v59 = vpop.f32.mrf.mxu0 }
 0x214   : > { %vm963_vm3 = vcmp.gt.f32.partialorder %v962_v62, 0.5  ;;  %p2065_p5 = por %p2064_p0, %p2063_p13 }
 0x215   : > { %v776_v20 = vrot.slane %v768_v16, %v2402_v34  ;;  %v792_v21 = vrot.slane %v784_v17, %v2402_v34  ;;  %v783_v27 = vrot.slane %v769_v18, %v2402_v34  ;;  %v799_v28 = vrot.slane %v785_v19, %v2402_v34 }
 0x216   : > { %v964_v63 = vsel %vm963_vm3, -inf, %v2177_v0  ;;  %p2066_p10 = pnand %p2065_p5, %p2059_p2 }
 0x217   : > { %v800_v25 = vcombine.low %v776_v20, %v792_v21  ;;  %v801_v26 = vcombine.high %v776_v20, %v792_v21  ;;  %v802_v36 = vcombine.low %v783_v27, %v799_v28  ;;  %v803_v37 = vcombine.high %v783_v27, %v799_v28  ;;  %v807_v28 = vpop.permute.xlu1 %806 }
 0x219   : > { %v956_v29 = vpack.c.bf16 %v800_v25, %v800_v25  ;;  %v957_v30 = vpack.c.bf16 %v801_v26, %v801_v26  ;;  %v958_v42 = vpack.c.bf16 %v802_v36, %v802_v36  ;;  %v959_v43 = vpack.c.bf16 %v803_v37, %v803_v37 }
 0x21b   : > { %v970_v33 = vsel %vm965_vm2, %v956_v29, 0  ;;  %v1016_v35 = vsel %vm965_vm2, %v957_v30, 0  ;;  %v1062_v48 = vsel %vm965_vm2, %v958_v42, 0  ;;  %v1108_v49 = vsel %vm965_vm2, %v959_v43, 0  ;;  %v805_v29 = vpop.permute.xlu0 %804 }
 0x21c   : > { %1807 = vmatpush3.bf16.xpose.msra.mxu0 %v970_v33  ;;  %1813 = vmatpush3.bf16.xpose.msra.mxu1 %v1016_v35 }
 0x21d   : > { %1818 = vmatprep.subr.bf16.mxu0 %v2177_v0  ;;  %1824 = vmatprep.subr.bf16.mxu1 %v2177_v0 }
 0x223   : > { %1809 = vmatmul.mubr.msk.bf16.vlgmr.msra.gmra.mxu0 %vm965_vm2, %v952_v44  ;;  %1815 = vmatmul.mubr.msk.bf16.vlgmr.msra.gmra.mxu1 %vm965_vm2, %v953_v45 }
 0x224   : > { %1819 = vmatpush3.bf16.xpose.msra.mxu0 %v1062_v48  ;;  %1825 = vmatpush3.bf16.xpose.msra.mxu1 %v1108_v49 }
 0x225   : > { %1820 = vmatprep.mubr.msk.bf16.mxu0 %vm2178_vm0, %v2177_v0  ;;  %1826 = vmatprep.mubr.msk.bf16.mxu1 %vm2178_vm0, %v2177_v0 }
 0x226   : > { %1830 = vmatprep.subr.bf16.mxu0 %v2177_v0  ;;  %1836 = vmatprep.subr.bf16.mxu1 %v2177_v0 }
 0x22b   : > { %1821 = vmatmul.mubr.msk.bf16.vlgmr.msra.gmra.mxu0 %vm965_vm2, %v954_v52  ;;  %1827 = vmatmul.mubr.msk.bf16.vlgmr.msra.gmra.mxu1 %vm965_vm2, %v955_v53 }
 0x22c   : > { %1832 = vmatprep.mubr.msk.bf16.mxu0 %vm2178_vm0, %v2177_v0  ;;  %1838 = vmatprep.mubr.msk.bf16.mxu1 %vm2178_vm0, %v2177_v0 }
 0x2e3   : > { %v1006_v1 = vpop.f32.mrf.mxu0  ;;  %v1052_v2 = vpop.f32.mrf.mxu1 }
 0x2e4   : > { %v1007_v3 = vadd.f32 %v1006_v1, %v964_v63  ;;  %v1053_v4 = vadd.f32 %v1052_v2, %v964_v63 }
 0x2e5   : > { %v1810_v5 = vpop.f32.mrf.mxu0  ;;  %v1816_v6 = vpop.f32.mrf.mxu1 }
 0x2e6   : > { %v1153_v7 = vsel %vm965_vm2, %v1053_v4, -inf  ;;  %v1150_v8 = vsel %vm965_vm2, %v1007_v3, -inf }
 0x2e7   : > { %1154 = vmax.xlane.f32.xlu0 %v1153_v7  ;;  %v1055_v9 = vpop.f32.mrf.mxu1  ;;  %1151 = vmax.xlane.f32.xlu1 %v1150_v8  ;;  %v1009_v10 = vpop.f32.mrf.mxu0 }
 0x2e9   : > { %v1811_v11 = vpop.f32.mrf.mxu0  ;;  %v1817_v12 = vpop.f32.mrf.mxu1 }
 0x2eb   : > { %v1098_v15 = vpop.f32.mrf.mxu0  ;;  %v1144_v16 = vpop.f32.mrf.mxu1 }
 0x2ec   : > { %v2474_v23 = vadd.f32 %v1098_v15, %v964_v63  ;;  %v2476_v25 = vadd.f32 %v1144_v16, %v964_v63 }
 0x2ed   : > { %v1822_v17 = vpop.f32.mrf.mxu0  ;;  %v1828_v18 = vpop.f32.mrf.mxu1 }
 0x2ee   : > { %v1159_v26 = vsel %vm965_vm2, %v2476_v25, -inf  ;;  %v1156_v27 = vsel %vm965_vm2, %v2474_v23, -inf }
 0x2ef   : > { %v1101_v19 = vpop.f32.mrf.mxu0  ;;  %v1147_v20 = vpop.f32.mrf.mxu1 }
 0x2f1   : > { %v1823_v21 = vpop.f32.mrf.mxu0  ;;  %v1829_v22 = vpop.f32.mrf.mxu1 }
 0x2f8   : > { %808 = vrot.lane.b32.xlu1 %v2382_v14, %s2183_s8 }
 0x2fd   : > { %810 = vrot.lane.b32.xlu0 %v2380_v13, %s2183_s8  ;;  %s1551_s8 = scalar_lea.sflag [#allocation10], %s2353_s22 }
 0x31c   : > { %1160 = vmax.xlane.f32.xlu0 %v1159_v26  ;;  %1157 = vmax.xlane.f32.xlu1 %v1156_v27 }
 0x370   : > { %v1155_v30 = vpop.xlane.xlu0 %1154  ;;  %v1152_v31 = vpop.xlane.xlu1 %1151 }
 0x371   : > { %v1163_v14 = vsub.f32 %v1053_v4, %v1155_v30  ;;  %v1162_v32 = vsub.f32 %v1007_v3, %v1152_v31 }
 0x373   : > { %v1168_v33 = vmul.f32 1.442695, %v1163_v14  ;;  %v1166_v13 = vmul.f32 1.442695, %v1162_v32 }
 0x374   : > { %v811_v35 = vpop.permute.xlu0 %810  ;;  %v809_v36 = vpop.permute.xlu1 %808 }
 0x375   : > { %1960 = vpow2.f32 %v1168_v33  ;;  %v832_v37 = vcombine.low %v807_v28, %v811_v35  ;;  %v833_v38 = vcombine.high %v807_v28, %v811_v35  ;;  %v816_v39 = vcombine.low %v805_v29, %v809_v36 }
 0x376   : > { %1962 = vpow2.f32 %v1166_v13  ;;  %v817_v40 = vcombine.high %v805_v29, %v809_v36 }
 0x377   : > { %v840_v41 = vrot.slane %v832_v37, %v2394_v24  ;;  %v847_v42 = vrot.slane %v833_v38, %v2394_v24  ;;  %v824_v43 = vrot.slane %v816_v39, %v2394_v24 }
 0x378   : > { %v831_v44 = vrot.slane %v817_v40, %v2394_v24 }
 0x379   : > { %v848_v45 = vcombine.low %v824_v43, %v840_v41  ;;  %v849_v46 = vcombine.high %v824_v43, %v840_v41 }
 0x37a   : > { %v864_v47 = vcombine.low %v831_v44, %v847_v42  ;;  %v865_v48 = vcombine.high %v831_v44, %v847_v42 }
 0x37b   : > { %v856_v49 = vrot.slane %v848_v45, %v2402_v34  ;;  %v863_v50 = vrot.slane %v849_v46, %v2402_v34 }
 0x37c   : > { %v872_v51 = vrot.slane %v864_v47, %v2402_v34  ;;  %v879_v52 = vrot.slane %v865_v48, %v2402_v34 }
 0x37d   : > { %v884_v53 = vcombine.low %v856_v49, %v863_v50  ;;  %v1750_v54 = vcombine.high %v856_v49, %v863_v50 }
 0x37e   : > { %v900_v55 = vcombine.low %v872_v51, %v879_v52  ;;  %v1751_v56 = vcombine.high %v872_v51, %v879_v52 }
 0x37f   : > { %v891_v57 = vrot.slane %v884_v53, %v2394_v24  ;;  %v899_v58 = vrot.slane %v1750_v54, %v2394_v24 }
 0x380   : > { %v907_v59 = vrot.slane %v900_v55, %v2394_v24  ;;  %v915_v60 = vrot.slane %v1751_v56, %v2394_v24 }
 0x381   : > { %v916_v61 = vcombine.low %v891_v57, %v899_v58  ;;  %v917_v62 = vcombine.high %v891_v57, %v899_v58 }
 0x382   : > { %v1961_v63 = vpop.eup %1960  ;;  %v932_v1 = vcombine.low %v907_v59, %v915_v60  ;;  %v933_v2 = vcombine.high %v907_v59, %v915_v60 }
 0x383   : > { %v1963_v3 = vpop.eup %1962  ;;  %v1177_v4 = vsel %vm965_vm2, %v1961_v63, 0.0  ;;  %v924_v5 = vrot.slane %v916_v61, %v2402_v34  ;;  %v931_v6 = vrot.slane %v917_v62, %v2402_v34  ;;  %v1187_v26 = vpack.c.bf16 %v1961_v63, %v1961_v63 }
 0x384   : > { %v1174_v7 = vsel %vm965_vm2, %v1963_v3, 0.0  ;;  %1178 = vadd.xlane.f32.xlu1 %v1177_v4  ;;  %v940_v8 = vrot.slane %v932_v1, %v2402_v34  ;;  %v947_v9 = vrot.slane %v933_v2, %v2402_v34  ;;  %v1186_v22 = vpack.c.bf16 %v1963_v3, %v1963_v3 }
 0x385   : > { %1175 = vadd.xlane.f32.xlu0 %v1174_v7 }
 0x386   : > { %v948_v10 = vcombine.low %v924_v5, %v940_v8  ;;  %v949_v11 = vcombine.high %v924_v5, %v940_v8  ;;  %v950_v12 = vcombine.low %v931_v6, %v947_v9  ;;  %v951_v15 = vcombine.high %v931_v6, %v947_v9 }
 0x388   : > { %v1190_v16 = vpack.c.bf16 %v948_v10, %v948_v10  ;;  %v1191_v17 = vpack.c.bf16 %v949_v11, %v949_v11  ;;  %v1192_v20 = vpack.c.bf16 %v950_v12, %v950_v12  ;;  %v1193_v21 = vpack.c.bf16 %v951_v15, %v951_v15 }
 0x38a   : > { %v1199_v18 = vsel %vm1197_vm4, %v1190_v16, 0  ;;  %v1245_v19 = vsel %vm1197_vm4, %v1191_v17, 0  ;;  %v1291_v27 = vsel %vm1197_vm4, %v1192_v20, 0  ;;  %v1337_v28 = vsel %vm1197_vm4, %v1193_v21, 0 }
 0x38b   : > { %1831 = vmatpush3.bf16.msra.mxu0 %v1199_v18  ;;  %1837 = vmatpush3.bf16.msra.mxu1 %v1245_v19 }
 0x38c   : > { %1842 = vmatprep.subr.bf16.mxu0 %v2177_v0  ;;  %1848 = vmatprep.subr.bf16.mxu1 %v2177_v0 }
 0x38e   : > { %1833 = vmatmul.mubr.msk.bf16.vlgmr.msra.gmra.mxu0 %vm965_vm2, %v1186_v22  ;;  %1839 = vmatmul.mubr.msk.bf16.vlgmr.msra.gmra.mxu1 %vm965_vm2, %v1187_v26 }
 0x38f   : > { %1843 = vmatpush3.bf16.msra.mxu0 %v1291_v27  ;;  %1849 = vmatpush3.bf16.msra.mxu1 %v1337_v28 }
 0x390   : > { %1844 = vmatprep.mubr.msk.bf16.mxu0 %vm2178_vm0, %v2177_v0  ;;  %1850 = vmatprep.mubr.msk.bf16.mxu1 %vm2178_vm0, %v2177_v0 }
 0x3a5   : > { %v1161_v29 = vpop.xlane.xlu0 %1160  ;;  %v1158_v30 = vpop.xlane.xlu1 %1157 }
 0x3a6   : > { %v1165_v31 = vsub.f32 %v2476_v25, %v1161_v29  ;;  %v1164_v14 = vsub.f32 %v2474_v23, %v1158_v30 }
 0x3a8   : > { %v1172_v32 = vmul.f32 1.442695, %v1165_v31  ;;  %v1170_v33 = vmul.f32 1.442695, %v1164_v14 }
 0x3aa   : > { %1964 = vpow2.f32 %v1172_v32 }
 0x3ab   : > { %1966 = vpow2.f32 %v1170_v33 }
 0x3b7   : > { %v1965_v13 = vpop.eup %1964 }
 0x3b8   : > { %v1967_v35 = vpop.eup %1966  ;;  %v1183_v36 = vsel %vm965_vm2, %v1965_v13, 0.0  ;;  %v1189_v37 = vpack.c.bf16 %v1965_v13, %v1965_v13 }
 0x3b9   : > { %1184 = vadd.xlane.f32.xlu1 %v1183_v36  ;;  %v1180_v38 = vsel %vm965_vm2, %v1967_v35, 0.0  ;;  %v1188_v39 = vpack.c.bf16 %v1967_v35, %v1967_v35 }
 0x3ba   : > { %1181 = vadd.xlane.f32.xlu0 %v1180_v38  ;;  %1851 = vmatmul.mubr.msk.bf16.vlgmr.msra.gmra.mxu1 %vm965_vm2, %v1189_v37 }
 0x3bb   : > { %1845 = vmatmul.mubr.msk.bf16.vlgmr.msra.gmra.mxu0 %vm965_vm2, %v1188_v39 }
 0x40d   : > { %v1179_v45 = vpop.xlane.xlu1 %1178 }
 0x40e   : > { %v1176_v46 = vpop.xlane.xlu0 %1175  ;;  %1968 = vrcp.f32 %v1179_v45 }
 0x40f   : > { %1970 = vrcp.f32 %v1176_v46 }
 0x41b   : > { %v1969_v49 = vpop.eup %1968 }
 0x41c   : > { %v1971_v50 = vpop.eup %1970  ;;  %v1384_v53 = vmul.f32 0.35355338, %v1969_v49 }
 0x41d   : > { %v1383_v55 = vmul.f32 0.35355338, %v1971_v50 }
 0x442   : > { %v1185_v47 = vpop.xlane.xlu1 %1184 }
 0x443   : > { %v1182_v48 = vpop.xlane.xlu0 %1181  ;;  %1972 = vrcp.f32 %v1185_v47 }
 0x444   : > { %1974 = vrcp.f32 %v1182_v48 }
 0x44e   : > { %v1235_v0 = vpop.f32.mrf.mxu0  ;;  %v1281_v23 = vpop.f32.mrf.mxu1 }
 0x44f   : > { %v1388_v58 = vmul.f32 %v1384_v53, %v1281_v23  ;;  %v1387_v61 = vmul.f32 %v1383_v55, %v1235_v0 }
 0x450   : > { %v1834_v25 = vpop.f32.mrf.mxu0  ;;  %v1840_v40 = vpop.f32.mrf.mxu1 }
 0x451   : > { %v1973_v51 = vpop.eup %1972 }
 0x452   : > { %v1238_v41 = vpop.f32.mrf.mxu0  ;;  %v1284_v42 = vpop.f32.mrf.mxu1  ;;  %v1386_v54 = vmul.f32 0.35355338, %v1973_v51 }
 0x453   : > { %v1975_v52 = vpop.eup %1974 }
 0x454   : > { %v1835_v43 = vpop.f32.mrf.mxu0  ;;  %v1841_v44 = vpop.f32.mrf.mxu1  ;;  %v1385_v56 = vmul.f32 0.35355338, %v1975_v52 }
 0x47a   : > { %v1373_v57 = vpop.f32.mrf.mxu1 }
 0x47b   : > { %v1327_v59 = vpop.f32.mrf.mxu0  ;;  %v1390_v60 = vmul.f32 %v1386_v54, %v1373_v57 }
 0x47c   : > { %v1389_v62 = vmul.f32 %v1385_v56, %v1327_v59  ;;  %v1852_v63 = vpop.f32.mrf.mxu1 }
 0x47d   : > { %v1407_v1 = vcombine.low %v1388_v58, %v1390_v60  ;;  %v1408_v2 = vcombine.high %v1388_v58, %v1390_v60  ;;  %v1846_v3 = vpop.f32.mrf.mxu0 }
 0x47e   : > { %v1391_v4 = vcombine.low %v1387_v61, %v1389_v62  ;;  %v1392_v5 = vcombine.high %v1387_v61, %v1389_v62  ;;  %v1376_v6 = vpop.f32.mrf.mxu1 }
 0x47f   : > { %v1415_v7 = vrot.slane %v1407_v1, %v2394_v24  ;;  %v1422_v8 = vrot.slane %v1408_v2, %v2394_v24  ;;  %v1330_v9 = vpop.f32.mrf.mxu0 }
 0x480   : > { %v1399_v10 = vrot.slane %v1391_v4, %v2394_v24  ;;  %v1406_v11 = vrot.slane %v1392_v5, %v2394_v24  ;;  %v1853_v12 = vpop.f32.mrf.mxu1 }
 0x481   : > { %v1847_v15 = vpop.f32.mrf.mxu0 }
 0x482   : > { %v1423_v16 = vcombine.low %v1399_v10, %v1415_v7  ;;  %v1424_v17 = vcombine.high %v1399_v10, %v1415_v7  ;;  %v1439_v18 = vcombine.low %v1406_v11, %v1422_v8  ;;  %v1440_v19 = vcombine.high %v1406_v11, %v1422_v8 }
 0x484   : > { %v1431_v20 = vrot.slane %v1423_v16, %v2402_v34  ;;  %v1438_v21 = vrot.slane %v1424_v17, %v2402_v34  ;;  %v1447_v22 = vrot.slane %v1439_v18, %v2402_v34  ;;  %v1454_v26 = vrot.slane %v1440_v19, %v2402_v34 }
 0x486   : > { %v1459_v27 = vcombine.low %v1431_v20, %v1438_v21  ;;  %v1760_v28 = vcombine.high %v1431_v20, %v1438_v21  ;;  %v1475_v29 = vcombine.low %v1447_v22, %v1454_v26  ;;  %v1761_v30 = vcombine.high %v1447_v22, %v1454_v26 }
 0x488   : > { %v1466_v31 = vrot.slane %v1459_v27, %v2394_v24  ;;  %v1474_v14 = vrot.slane %v1760_v28, %v2394_v24  ;;  %v1482_v32 = vrot.slane %v1475_v29, %v2394_v24  ;;  %v1490_v33 = vrot.slane %v1761_v30, %v2394_v24 }
 0x48a   : > { %v1492_v13 = vcombine.high %v1466_v31, %v1474_v14  ;;  %v1508_v35 = vcombine.high %v1482_v32, %v1490_v33  ;;  %v1491_v36 = vcombine.low %v1466_v31, %v1474_v14  ;;  %v1507_v37 = vcombine.low %v1482_v32, %v1490_v33 }
 0x48c   : > { %v1506_v38 = vrot.slane %v1492_v13, %v2402_v34  ;;  %v1522_v24 = vrot.slane %v1508_v35, %v2402_v34  ;;  %v1499_v39 = vrot.slane %v1491_v36, %v2402_v34  ;;  %v1515_v0 = vrot.slane %v1507_v37, %v2402_v34 }
 0x48d   : > { %2069 = shalt.err (!%p2066_p10)
}
 0x48e   : > { %s2070_s18 = scalar_lea.hbm %s2536_s13, 128  ;;  %s2074_s1 = scalar_lea.hbm %s2624_s7, 256 }
 0x48f   : > { %p2071_p1 = scmp.ne.s32.totalorder %s2536_s13, %s2070_s18  ;;  %p2075_p12 = scmp.lt.s32.totalorder %s2536_s13, %s2624_s7 }
 0x490   : > { %p2076_p3 = scmp.lt.s32.totalorder %s2074_s1, %s2070_s18 }
 0x491   : > { %p2072_p4 = pnand %p2071_p1, %p2326_p7 }
 0x492   : > { %p2077_p8 = por %p2076_p3, %p2075_p12 }
 0x493   : > { %p2073_p6 = pneg %p2072_p4 }
 0x495   : > { %p2078_p9 = pnand %p2077_p8, %p2073_p6 }
 0x497   : > { %2081 = shalt.err (!%p2078_p9)
}
 0x498   : > { %1865 = dma.vmem_to_hbm [thread:$0]  (%p2326_p7), %s2539_s15, 128, %s2536_s13, %s1551_s8   ;;  %v1525_v34 = vcombine.low %v1506_v38, %v1522_v24  ;;  %v1524_v23 = vcombine.high %v1499_v39, %v1515_v0  ;;  %v1523_v25 = vcombine.low %v1499_v39, %v1515_v0  ;;  %v1526_v40 = vcombine.high %v1506_v38, %v1522_v24 }
 0x499   : > { %s2187_s14 = smov 16   ;;  %s2188_s10 = smov 8   ;;  %vm1540_vm5 = vcmask 130048   ;;  %vm1542_vm6 = vcmask 195584  }
 0x49a   : > { %1532 = vrot.lane.b32.xlu1 %v1525_v34, %s2187_s14  ;;  %1528 = vrot.lane.b32.xlu0 %v1524_v23, %s2188_s10  ;;  %s2189_s17 = smov 24   ;;  %s353_s13 = scalar_lea.vmem [#allocation8], %s1735_s19 }
 0x49b   : > { %s1565_s15 = sshll.u32 %s353_s13, 4  ;;  %s2574_s18 = scalar_lea.hbm %s2623_s6, %s1764_s4  ;;  %s1566_s15 = int_to_ptr.vmem [resolvable:$true] %s1565_s15 }
 0x49c   : > { %s1546_s23 = scalar_lea.sflag [#allocation4], %s2353_s22  ;;  %s2082_s30 = scalar_lea.vmem %s1566_s15, 128 }
 0x49d   : > { %p2083_p11 = scmp.ne.s32.totalorder %s1566_s15, %s2082_s30  ;;  %s2190_s19 = smov [#allocation8]  }
 0x49e   : > { %1536 = vrot.lane.b32.xlu1 %v1526_v40, %s2189_s17  ;;  %s2086_s1 = sshll.u32 %s2190_s19, 4  ;;  %s2087_s1 = int_to_ptr.vmem [resolvable:$false] %s2086_s1 }
 0x49f   : > { %p2084_p2 = pnand %p2083_p11, %p2326_p7  ;;  %s2088_s9 = scalar_lea.vmem %s2087_s1, 256 }
 0x4a0   : > { %p2089_p0 = scmp.lt.s32.totalorder %s1566_s15, %s2087_s1  ;;  %p2090_p5 = scmp.lt.s32.totalorder %s2088_s9, %s2082_s30 }
 0x4a1   : > { %p2085_p13 = pneg %p2084_p2 }
 0x4a2   : > { %p2091_p10 = por %p2090_p5, %p2089_p0 }
 0x4a4   : > { %p2092_p1 = pnand %p2091_p10, %p2085_p13 }
 0x50c   : > { %v1533_v41 = vpop.permute.xlu1 %1532  ;;  %v1529_v42 = vpop.permute.xlu0 %1528 }
 0x50d   : > { %v1539_v43 = vsel %vm965_vm2, %v1523_v25, %v1529_v42 }
 0x50e   : > { %v1541_v45 = vsel %vm1540_vm5, %v1539_v43, %v1533_v41 }
 0x510   : > { %v1537_v44 = vpop.permute.xlu1 %1536 }
 0x511   : > { %v1543_v46 = vsel %vm1542_vm6, %v1541_v45, %v1537_v44 }
 0x512   : > { %1544 = vst.msk [vmem:[%s353_s13] sm:$0xff] %vm394_vm1, %v1543_v46 }
 0x513   : > { %2095 = shalt.err (!%p2092_p1)
}
 0x514   : > { %s2096_s27 = scalar_lea.hbm %s2574_s18, 128  ;;  %s2100_s11 = scalar_lea.hbm %s2623_s6, 256 }
 0x515   : > { %p2097_p4 = scmp.ne.s32.totalorder %s2574_s18, %s2096_s27  ;;  %p2101_p3 = scmp.lt.s32.totalorder %s2574_s18, %s2623_s6 }
 0x516   : > { %p2102_p8 = scmp.lt.s32.totalorder %s2100_s11, %s2096_s27 }
 0x517   : > { %p2098_p6 = pnand %p2097_p4, %p2326_p7 }
 0x518   : > { %p2103_p9 = por %p2102_p8, %p2101_p3 }
 0x519   : > { %p2099_p12 = pneg %p2098_p6 }
 0x51b   : > { %p2104_p11 = pnand %p2103_p9, %p2099_p12 }
 0x51d   : > { %2107 = shalt.err (!%p2104_p11)
}
 0x51e   : > { %1864 = dma.vmem_to_hbm [thread:$0]  (%p2326_p7), %s1566_s15, 128, %s2574_s18, %s1546_s23  }
 0x51f PF: > { %s1590_s17 = sand.u32 1, %s2150_s24   ;;  %p2644_p2 = scmp.ne.s32.totalorder %s2634_s12, 0 }
 0x520   : > { %p2645_p13 = scmp.ge.s32.totalorder %s2170_s29, 2  ;;  %s1591_s13 = scalar_lea.sflag [#allocation4], %s1590_s17 }
 0x522   : > { %p1880_p0 = pnand %p2645_p13, %p2644_p2 }
 0x524   : > { %p1881_p5 = pneg %p1880_p0 }
 0x526   : > { %2141 = dma.done.wait (%p1881_p5), %s1591_s13, 128  }
 0x527   : > { %2143 = vsyncadd (%p1881_p5), %s1591_s13, 4294967168  ;;  %s1600_s8 = scalar_lea.sflag [#allocation10], %s1590_s17 }
 0x528   : > { %2145 = dma.done.wait (%p1881_p5), %s1600_s8, 128  }
 0x529   : > { %2147 = vsyncadd (%p1881_p5), %s1600_s8, 4294967168  ;;  %s28_s29 = sadd.s32 1, %s2170_s29   ;;  %s2646_s16 = sld [smem:[#allocation15_spill]] }
 0x52a   : > { %p25_p10 = scmp.ge.s32.totalorder %s28_s29, 4   ;;  %s2647_s24 = smov %s2154_s25 }
 0x52b   : > { %s2648_s25 = smov %s2158_s26  ;;  %s2649_s26 = smov %s2335_s21 }
 0x52c   : > { %s2650_s27 = smov %s2166_s28  ;;  %27 = sbr.rel (!%p25_p10) target bundleno = 12 (0xc), region = 123 }
 0x52f   : > { %s2651_s28 = smov %s2646_s16 }
 0x531   :  { %1605 = vsyncpa [#allocation3], 1 }
 0x532   :  { %1607 = vsyncpa [#allocation3 + $0x1], 1 }
 0x533   :  { %1608 = vsyncpa [#allocation6], 1 }
 0x534   :  { %1609 = vsyncpa [#allocation4], 1 }
 0x535   :  { %1611 = vsyncpa [#allocation4 + $0x1], 1 }
 0x536   :  { %1612 = vsyncpa [#allocation10], 1 }
 0x537   :  { %1614 = vsyncpa [#allocation10 + $0x1], 1 }

</bundles_post_ra>
